<compile_context>
chip_gen: v6e
topology: v6e:2x2x1
jax: 0.10.0
libtpu: 0.0.40
codegen_flags: <defaults>
</compile_context>

<pallas_src>
import math
import functools

import jax
import jax.numpy as jnp
from jax import lax
from jax.experimental import pallas as pl
from jax.experimental.pallas import tpu as pltpu


# ----------------------------------------------------------------------------
# Generation-aware defaults (tile preferences + scoped-VMEM limit).
# ----------------------------------------------------------------------------
_GEN_CACHE = None


def _gen_defaults():
    global _GEN_CACHE
    if _GEN_CACHE is None:
        try:
            vmem = pltpu.get_tpu_info().vmem_capacity_bytes
        except Exception:
            vmem = 64 * 1024 * 1024          # be conservative (v7x-sized)
        if vmem >= 96 * 1024 * 1024:         # v5e / v6e: 128 MiB physical VMEM
            _GEN_CACHE = dict(vmem_limit_bytes=80 * 1024 * 1024,
                              lin_tm=512, lin_tn=512, lin_tk=1024,
                              attn_tq=256, attn_tk=512)
        else:                                 # v7x: 64 MiB physical per TC
            _GEN_CACHE = dict(vmem_limit_bytes=40 * 1024 * 1024,
                              lin_tm=512, lin_tn=256, lin_tk=512,
                              attn_tq=256, attn_tk=256)
    return _GEN_CACHE


# ----------------------------------------------------------------------------
# Tile-size helpers (respect the (8, 128) BlockSpec constraint).
# ----------------------------------------------------------------------------
def _round_up(x, m):
    return ((x + m - 1) // m) * m


def _pick_sublane_tile(dim, preferred):
    """Largest divisor of `dim` <= preferred that is a multiple of 8 (prefer 128),
    else the full dim."""
    if dim <= preferred:
        return dim
    for align in (128, 8):
        if dim % align == 0:
            t = (preferred // align) * align
            while t >= align:
                if dim % t == 0:
                    return t
                t -= align
    return dim


def _pick_lane_tile(dim, preferred):
    """Largest divisor of `dim` <= preferred that is a multiple of 128, else full dim."""
    if dim <= preferred or dim % 128 != 0:
        return dim
    t = (preferred // 128) * 128
    while t >= 128:
        if dim % t == 0:
            return t
        t -= 128
    return dim


def _pick_head_group(num_heads, depth):
    """Smallest divisor hb of H with hb*Dh % 128 == 0, grown toward hb*Dh ~ 256.
    Returns None when no 128-aligned head group exists (tiny d_model)."""
    hb = None
    for cand in range(1, num_heads + 1):
        if num_heads % cand == 0 and (cand * depth) % 128 == 0:
            hb = cand
            break
    if hb is None:
        return None
    while hb * 2 <= num_heads and num_heads % (hb * 2) == 0 and (hb * 2) * depth <= 256:
        hb *= 2
    return hb


def _buffered_spec(block_shape, index_map, nbuf):
    """BlockSpec with deeper pipelining; falls back to default double-buffering
    if this jax version does not expose pipeline_mode."""
    try:
        return pl.BlockSpec(block_shape, index_map, pipeline_mode=pl.Buffered(nbuf))
    except Exception:
        return pl.BlockSpec(block_shape, index_map)


# ----------------------------------------------------------------------------
# Kernel 1: tiled linear  y = x @ W + b   (W already stored as (Din, Dout))
# ----------------------------------------------------------------------------
def _linear_kernel(x_ref, w_ref, b_ref, o_ref, acc_ref, *, mxu_dtype):
    k = pl.program_id(2)

    @pl.when(k == 0)
    def _():
        acc_ref[...] = jnp.zeros_like(acc_ref)

    acc_ref[...] += jnp.dot(
        x_ref[...].astype(mxu_dtype),
        w_ref[...].astype(mxu_dtype),
        preferred_element_type=jnp.float32,
    )

    @pl.when(k == pl.num_programs(2) - 1)
    def _():
        o_ref[...] = (acc_ref[...] + b_ref[...]).astype(o_ref.dtype)


def pallas_linear(x2d, w_t, bias, *, mxu_dtype=jnp.bfloat16, out_dtype=None,
                  tm_pref=None, tn_pref=None, tk_pref=None):
    """x2d: (M, Din); w_t: (Din, Dout) pre-transposed; bias: (Dout,) float32."""
    gd = _gen_defaults()
    tm_pref = tm_pref or gd["lin_tm"]
    tn_pref = tn_pref or gd["lin_tn"]
    tk_pref = tk_pref or gd["lin_tk"]

    M, Din = x2d.shape
    Dout = w_t.shape[1]
    out_dtype = out_dtype or x2d.dtype

    tm = _pick_sublane_tile(M, tm_pref)
    tn = _pick_lane_tile(Dout, tn_pref)
    tk = _pick_lane_tile(Din, tk_pref)
    grid = (M // tm, Dout // tn, Din // tk)

    kernel = functools.partial(_linear_kernel, mxu_dtype=mxu_dtype)
    return pl.pallas_call(
        kernel,
        out_shape=jax.ShapeDtypeStruct((M, Dout), out_dtype),
        grid_spec=pltpu.PrefetchScalarGridSpec(
            num_scalar_prefetch=0,
            grid=grid,
            in_specs=[
                pl.BlockSpec((tm, tk), lambda i, j, k: (i, k)),
                pl.BlockSpec((tk, tn), lambda i, j, k: (k, j)),
                pl.BlockSpec((1, tn), lambda i, j, k: (0, j)),
            ],
            out_specs=pl.BlockSpec((tm, tn), lambda i, j, k: (i, j)),
            scratch_shapes=[pltpu.VMEM((tm, tn), jnp.float32)],
        ),
        compiler_params=pltpu.CompilerParams(
            dimension_semantics=("parallel", "parallel", "arbitrary"),
            vmem_limit_bytes=gd["vmem_limit_bytes"],
        ),
    )(x2d, w_t, bias.reshape(1, Dout))


# ----------------------------------------------------------------------------
# Kernel 2: flash-style attention over the merged 2-D activation layout.
#   q_src/k_src/v_src: 2-D (B*S, width) arrays; column-block offsets select the
#   Q/K/V sections of a fused projection.  Output: (B*Sq, D) merged layout.
# ----------------------------------------------------------------------------
def _flash_attn_kernel(q_ref, k_ref, v_ref, *rest, hb, depth, tq, tk,
                       has_mask, is_causal, kv_len, mxu_dtype, approx_recip):
    if has_mask:
        mask_ref, o_ref, m_sc, l_sc, acc_sc = rest
    else:
        o_ref, m_sc, l_sc, acc_sc = rest
        mask_ref = None

    qi = pl.program_id(2)
    ki = pl.program_id(3)

    @pl.when(ki == 0)
    def _():
        m_sc[...] = jnp.full_like(m_sc, -jnp.inf)
        l_sc[...] = jnp.zeros_like(l_sc)
        acc_sc[...] = jnp.zeros_like(acc_sc)

    def step():
        neg = jnp.float32(-1e9)
        bias = None
        if has_mask:
            # Matches torch: logits += mask * -1e9 (mask streamed in f32; the
            # scale is applied in-kernel so arbitrary float masks keep precision).
            bias = mask_ref[0] * neg
        if is_causal or (kv_len is not None):
            col = lax.broadcasted_iota(jnp.int32, (tq, tk), 1) + ki * tk
            bad = None
            if is_causal:
                row = lax.broadcasted_iota(jnp.int32, (tq, tk), 0) + qi * tq
                bad = col > row
            if kv_len is not None:                 # padded KV columns
                oob = col >= kv_len
                bad = oob if bad is None else (bad | oob)
            struct = jnp.where(bad, neg, jnp.float32(0.0))
            bias = struct if bias is None else bias + struct

        for h in range(hb):                        # static, short head loop
            sl = slice(h * depth, (h + 1) * depth)
            s = lax.dot_general(                   # NT contraction, no transpose
                q_ref[:, sl].astype(mxu_dtype), k_ref[:, sl].astype(mxu_dtype),
                (((1,), (1,)), ((), ())),
                preferred_element_type=jnp.float32)          # (tq, tk) f32
            if bias is not None:
                s = s + bias

            # Online softmax -- elementwise math kept in f32 (v5e-safe).
            m_prev = m_sc[h]
            m_new = jnp.maximum(m_prev, jnp.max(s, axis=-1, keepdims=True))
            alpha = jnp.exp(m_prev - m_new)
            p = jnp.exp(s - m_new)
            l_sc[h] = alpha * l_sc[h] + jnp.sum(p, axis=-1, keepdims=True)
            acc_sc[h] = alpha * acc_sc[h] + jnp.dot(
                p.astype(mxu_dtype), v_ref[:, sl].astype(mxu_dtype),
                preferred_element_type=jnp.float32)
            m_sc[h] = m_new

    if is_causal:
        # Skip KV tiles entirely above the diagonal (no MXU/EUP work for them).
        pl.when(ki * tk <= qi * tq + (tq - 1))(step)
    else:
        step()

    @pl.when(ki == pl.num_programs(3) - 1)
    def _():
        outs = []
        for h in range(hb):
            if approx_recip:
                inv = pl.reciprocal(l_sc[h], approx=True)    # EUP slot, ~free
            else:
                inv = 1.0 / l_sc[h]
            outs.append(acc_sc[h] * inv)
        # One lane-dense store of the whole (tq, hb*depth) block.
        o_ref[...] = jnp.concatenate(outs, axis=-1).astype(o_ref.dtype)


def pallas_flash_attention(q_src, k_src, v_src, *, batch, num_heads, depth, hb,
                           q_colblk, k_colblk, v_colblk,
                           mask=None, is_causal=False, kv_len=None,
                           mxu_dtype=jnp.bfloat16, out_dtype=None,
                           approx_recip=True, tq_pref=None, tk_pref=None):
    gd = _gen_defaults()
    tq_pref = tq_pref or gd["attn_tq"]
    tk_pref = tk_pref or gd["attn_tk"]

    d_model = num_heads * depth
    bw = hb * depth
    n_groups = num_heads // hb
    out_dtype = out_dtype or q_src.dtype

    sq_pad = q_src.shape[0] // batch
    sk_pad = k_src.shape[0] // batch
    tq = _pick_sublane_tile(sq_pad, tq_pref)
    tk = _pick_lane_tile(sk_pad, tk_pref)
    nq = sq_pad // tq
    nk = sk_pad // tk
    grid = (batch, n_groups, nq, nk)

    kv_guard = kv_len if (kv_len is not None and kv_len != sk_pad) else None
    has_mask = mask is not None

    kernel = functools.partial(
        _flash_attn_kernel, hb=hb, depth=depth, tq=tq, tk=tk,
        has_mask=has_mask, is_causal=is_causal, kv_len=kv_guard,
        mxu_dtype=mxu_dtype, approx_recip=approx_recip)

    in_specs = [
        pl.BlockSpec((tq, bw), lambda b, g, qi, ki: (b * nq + qi, q_colblk + g)),
        _buffered_spec((tk, bw), lambda b, g, qi, ki: (b * nk + ki, k_colblk + g), 3),
        _buffered_spec((tk, bw), lambda b, g, qi, ki: (b * nk + ki, v_colblk + g), 3),
    ]
    args = [q_src, k_src, v_src]
    if has_mask:
        if mask.shape[0] == 1:     # mask broadcast over batch: never duplicated in HBM
            mspec = pl.BlockSpec((1, tq, tk), lambda b, g, qi, ki: (0, qi, ki))
        else:
            mspec = pl.BlockSpec((1, tq, tk), lambda b, g, qi, ki: (b, qi, ki))
        in_specs.append(mspec)
        args.append(mask)

    return pl.pallas_call(
        kernel,
        out_shape=jax.ShapeDtypeStruct((batch * sq_pad, d_model), out_dtype),
        grid_spec=pltpu.PrefetchScalarGridSpec(
            num_scalar_prefetch=0,
            grid=grid,
            in_specs=in_specs,
            out_specs=pl.BlockSpec((tq, bw), lambda b, g, qi, ki: (b * nq + qi, g)),
            scratch_shapes=[
                pltpu.VMEM((hb, tq, 1), jnp.float32),      # running max per head
                pltpu.VMEM((hb, tq, 1), jnp.float32),      # running denom per head
                pltpu.VMEM((hb, tq, depth), jnp.float32),  # running acc per head
            ],
        ),
        compiler_params=pltpu.CompilerParams(
            dimension_semantics=("parallel", "parallel", "parallel", "arbitrary"),
            vmem_limit_bytes=gd["vmem_limit_bytes"],
        ),
    )(*args)


# ----------------------------------------------------------------------------
# Module wrapper (parameter container + forward)
# ----------------------------------------------------------------------------
class MultiHeadAttentionPallas:
    def __init__(self, d_model, num_heads, key, compute_dtype=jnp.bfloat16,
                 approx_recip=True):
        assert d_model % num_heads == 0
        self.d_model = d_model
        self.num_heads = num_heads
        self.depth = d_model // num_heads
        self.compute_dtype = compute_dtype
        self.approx_recip = approx_recip
        self.head_group = _pick_head_group(num_heads, self.depth)

        # Deterministic init mimicking nn.Linear default (uniform +-1/sqrt(fan_in)).
        bound = 1.0 / math.sqrt(d_model)
        keys = jax.random.split(key, 8)

        def lin(kw, kb):
            w = jax.random.uniform(kw, (d_model, d_model), jnp.float32, -bound, bound)
            b = jax.random.uniform(kb, (d_model,), jnp.float32, -bound, bound)
            return w, b

        # PyTorch-convention parameters (kept for the pure-JAX reference).
        self.wq_w, self.wq_b = lin(keys[0], keys[1])
        self.wk_w, self.wk_b = lin(keys[2], keys[3])
        self.wv_w, self.wv_b = lin(keys[4], keys[5])
        self.dense_w, self.dense_b = lin(keys[6], keys[7])

        # Kernel-side parameters prepared ONCE at init: transposed to (Din, Dout),
        # 1/sqrt(depth) folded into Wq/bq, Q|K|V (and K|V) fused, cast to the MXU
        # compute dtype (bf16 halves weight DMA on v6e/v7x).
        scale = 1.0 / math.sqrt(self.depth)
        cd = compute_dtype
        wq_t = (self.wq_w.T * scale).astype(cd)
        wk_t = self.wk_w.T.astype(cd)
        wv_t = self.wv_w.T.astype(cd)
        self._wq_t, self._wk_t, self._wv_t = wq_t, wk_t, wv_t
        self._bq_s = self.wq_b * scale
        self._w_qkv = jnp.concatenate([wq_t, wk_t, wv_t], axis=1)
        self._b_qkv = jnp.concatenate([self._bq_s, self.wk_b, self.wv_b])
        self._w_kv = jnp.concatenate([wk_t, wv_t], axis=1)
        self._b_kv = jnp.concatenate([self.wk_b, self.wv_b])
        self._w_out = self.dense_w.T.astype(cd)
        self._b_out = self.dense_b

    def __call__(self, q, k, v, mask=None):
        B, Sq, D = q.shape
        Sk = k.shape[1]
        H, Dh = self.num_heads, self.depth
        cd = self.compute_dtype
        in_dtype = q.dtype

        is_causal = isinstance(mask, str)
        if is_causal:
            assert mask == "causal", f"unsupported mask string: {mask}"

        self_attn = (q is k) and (k is v)
        kv_same = (k is v)

        # --- pad sequence dims to sublane multiples (rare fallback path) ------
        sq_pad = _round_up(max(Sq, 8), 8)
        sk_pad = _round_up(max(Sk, 8), 8)

        def pad_seq(x, s, s_pad):
            return x if s_pad == s else jnp.pad(x, ((0, 0), (0, s_pad - s), (0, 0)))

        qx = pad_seq(q, Sq, sq_pad)
        if self_attn:
            kx = vx = qx
        else:
            kx = pad_seq(k, Sk, sk_pad)
            vx = kx if kv_same else pad_seq(v, Sk, sk_pad)

        Mq, Mk = B * sq_pad, B * sk_pad
        grouped = self.head_group is not None
        hb = self.head_group if grouped else H
        bw = hb * Dh

        # --- projections (fused; outputs stay in the merged 2-D layout) -------
        if grouped and self_attn:
            qkv = pallas_linear(qx.reshape(Mq, D), self._w_qkv, self._b_qkv,
                                mxu_dtype=cd, out_dtype=cd)          # (Mq, 3D)
            q_src = k_src = v_src = qkv
            q_cb, k_cb, v_cb = 0, D // bw, 2 * (D // bw)
        elif grouped and kv_same:
            q_src = pallas_linear(qx.reshape(Mq, D), self._wq_t, self._bq_s,
                                  mxu_dtype=cd, out_dtype=cd)
            kv = pallas_linear(kx.reshape(Mk, D), self._w_kv, self._b_kv,
                               mxu_dtype=cd, out_dtype=cd)           # (Mk, 2D)
            k_src = v_src = kv
            q_cb, k_cb, v_cb = 0, 0, D // bw
        else:
            # TODO(synk): when d_model has no 128-aligned head group (tiny d_model)
            # projections stay unfused and the attention block width falls back to
            # the full d_model (still satisfies the (8,128) block constraint).
            q_src = pallas_linear(qx.reshape(Mq, D), self._wq_t, self._bq_s,
                                  mxu_dtype=cd, out_dtype=cd)
            k_src = pallas_linear(kx.reshape(Mk, D), self._wk_t, self.wk_b,
                                  mxu_dtype=cd, out_dtype=cd)
            v_src = pallas_linear(vx.reshape(Mk, D), self._wv_t, self.wv_b,
                                  mxu_dtype=cd, out_dtype=cd)
            q_cb = k_cb = v_cb = 0

        # --- mask: None / "causal" (in-kernel) / compact streamed f32 bias ----
        mask_arr = None
        if (mask is not None) and (not is_causal):
            m = jnp.asarray(mask, jnp.float32)
            if m.ndim < 4:
                m = m.reshape((1,) * (4 - m.ndim) + m.shape)
            assert m.shape[1] == 1, "per-head masks not supported"  # TODO(synk)
            assert m.shape[0] in (1, B)
            m = jnp.broadcast_to(m, (m.shape[0], 1, Sq, Sk))[:, 0]   # (B_m, Sq, Sk)
            if sq_pad != Sq or sk_pad != Sk:
                m = jnp.pad(m, ((0, 0), (0, sq_pad - Sq), (0, sk_pad - Sk)))
            mask_arr = m

        # --- flash attention straight into the merged (Mq, D) layout ----------
        attn2d = pallas_flash_attention(
            q_src, k_src, v_src,
            batch=B, num_heads=H, depth=Dh, hb=hb,
            q_colblk=q_cb, k_colblk=k_cb, v_colblk=v_cb,
            mask=mask_arr, is_causal=is_causal,
            kv_len=Sk if sk_pad != Sk else None,
            mxu_dtype=cd, out_dtype=cd, approx_recip=self.approx_recip)

        # --- final dense projection (no transpose/reshape glue needed) --------
        out2d = pallas_linear(attn2d, self._w_out, self._b_out,
                              mxu_dtype=cd, out_dtype=in_dtype)
        out = out2d.reshape(B, sq_pad, D)
        if sq_pad != Sq:
            out = out[:, :Sq]
        return out


# ----------------------------------------------------------------------------
# Pure-JAX reference for validation (mirrors the PyTorch forward exactly).
# ----------------------------------------------------------------------------
def reference_mha(mod, q, k, v, mask=None):
    B, Sq, D = q.shape
    H, Dh = mod.num_heads, mod.depth

    def lin(x, w, b):
        return x @ w.T + b

    qp = lin(q, mod.wq_w, mod.wq_b)
    kp = lin(k, mod.wk_w, mod.wk_b)
    vp = lin(v, mod.wv_w, mod.wv_b)

    def split(x, S):
        return jnp.transpose(x.reshape(B, S, H, Dh), (0, 2, 1, 3))

    qh, kh, vh = split(qp, Sq), split(kp, k.shape[1]), split(vp, v.shape[1])
    logits = jnp.einsum("bhqd,bhkd->bhqk", qh, kh) / math.sqrt(Dh)
    if mask is not None:
        logits = logits + mask * (-1e9)
    w = jax.nn.softmax(logits, axis=-1)
    o = jnp.einsum("bhqk,bhkd->bhqd", w, vh)
    o = jnp.transpose(o, (0, 2, 1, 3)).reshape(B, Sq, D)
    return lin(o, mod.dense_w, mod.dense_b)


if __name__ == "__main__":
    key = jax.random.PRNGKey(0)
    kp1, kp2, kx, kq, kk, kv = jax.random.split(key, 6)

    # ---- Config A: tiny d_model=32 (ungrouped / full-dim fallback path) -------
    B, S, D, H = 2, 8, 32, 4
    x = jax.random.normal(kx, (B, S, D), jnp.float32)
    q = jax.random.normal(kq, (B, S, D), jnp.float32)
    k = jax.random.normal(kk, (B, S, D), jnp.float32)
    v = jax.random.normal(kv, (B, S, D), jnp.float32)
    causal = jnp.triu(jnp.ones((S, S), jnp.float32), k=1)[None, None]   # 1 = masked

    mha = MultiHeadAttentionPallas(D, H, kp1, compute_dtype=jnp.float32,
                                   approx_recip=False)
    out_self = jax.block_until_ready(mha(x, x, x))
    ref_self = reference_mha(mha, x, x, x)
    assert out_self.shape == (B, S, D)
    assert jnp.allclose(out_self, ref_self, atol=1e-4, rtol=1e-4), "self-attn mismatch"

    out_cross = jax.block_until_ready(mha(q, k, v, mask=causal))
    ref_cross = reference_mha(mha, q, k, v, mask=causal)
    assert jnp.allclose(out_cross, ref_cross, atol=1e-4, rtol=1e-4), "masked mismatch"

    # ---- Config B: d_model=256 (fused QKV + direct 2-D indexing + head groups) -
    B2, S2, D2, H2 = 2, 16, 256, 4
    x2 = jax.random.normal(kq, (B2, S2, D2), jnp.float32)
    y2 = jax.random.normal(kk, (B2, S2, D2), jnp.float32)
    causal2 = jnp.triu(jnp.ones((S2, S2), jnp.float32), k=1)[None, None]

    mha2 = MultiHeadAttentionPallas(D2, H2, kp2, compute_dtype=jnp.float32,
                                    approx_recip=False)
    ref_c = reference_mha(mha2, x2, x2, x2, mask=causal2)
    out_ik = jax.block_until_ready(mha2(x2, x2, x2, mask="causal"))   # in-kernel mask
    assert jnp.allclose(out_ik, ref_c, atol=1e-4, rtol=1e-4), "in-kernel causal mismatch"
    out_st = jax.block_until_ready(mha2(x2, x2, x2, mask=causal2))    # streamed mask
    assert jnp.allclose(out_st, ref_c, atol=1e-4, rtol=1e-4), "streamed mask mismatch"

    out_kv = jax.block_until_ready(mha2(x2, y2, y2))                  # fused-KV path
    ref_kv = reference_mha(mha2, x2, y2, y2)
    assert jnp.allclose(out_kv, ref_kv, atol=1e-4, rtol=1e-4), "fused-KV mismatch"

    # ---- Default fast path: bf16 MXU + approx reciprocal (v6e/v7x) ------------
    mha2_fast = MultiHeadAttentionPallas(D2, H2, kp2)                 # bf16 defaults
    out_fast = jax.block_until_ready(mha2_fast(x2, x2, x2, mask="causal"))
    assert out_fast.shape == (B2, S2, D2)
    assert jnp.allclose(out_fast.astype(jnp.float32), ref_c,
                        atol=1e-1, rtol=1e-1), "bf16 fast path diverged"

    print("KERNEL_OK")
</pallas_src>

<mosaic_0001>
module attributes {stable_mosaic.version = 11 : i64} {
  func.func @_linear_kernel(%arg0: i32, %arg1: i32, %arg2: i32, %arg3: memref<16x32xf32, #tpu.memory_space<vmem>>, %arg4: memref<32x32xf32, #tpu.memory_space<vmem>>, %arg5: memref<1x32xf32, #tpu.memory_space<vmem>>, %arg6: memref<16x32xf32, #tpu.memory_space<vmem>>, %arg7: memref<16x32xf32, #tpu.memory_space<vmem>>) attributes {dimension_semantics = [#tpu.dimension_semantics<parallel>, #tpu.dimension_semantics<parallel>, #tpu.dimension_semantics<arbitrary>], iteration_bounds = array<i64: 1, 1, 1>, scalar_prefetch = 0 : i64, scratch_operands = 1 : i64, tpu.core_type = #tpu.core_type<tc>, window_params = [{transform_indices = @transform_0, window_bounds = array<i64: 16, 32>}, {transform_indices = @transform_1, window_bounds = array<i64: 32, 32>}, {transform_indices = @transform_2, window_bounds = array<i64: 1, 32>}, {transform_indices = @transform_3, window_bounds = array<i64: 16, 32>}]} {
    %c0_i32 = arith.constant 0 : i32
    %0 = arith.cmpi eq, %arg2, %c0_i32 : i32
    %1 = arith.extui %0 : i1 to i32
    %c0_i32_0 = arith.constant 0 : i32
    %2 = arith.cmpi ne, %1, %c0_i32_0 : i32
    scf.if %2 {
      %cst_10 = arith.constant 0.000000e+00 : f32
      %12 = vector.broadcast %cst_10 : f32 to vector<16x32xf32>
      %c0_11 = arith.constant 0 : index
      %c0_12 = arith.constant 0 : index
      %13 = vector.load %arg7[%c0_11, %c0_12] : memref<16x32xf32, #tpu.memory_space<vmem>>, vector<16x32xf32>
      tpu.vector_store %arg7[%c0_11, %c0_12], %12 {strides = array<i32>} : memref<16x32xf32, #tpu.memory_space<vmem>>, vector<16x32xf32>,
    } else {
    }
    %c0 = arith.constant 0 : index
    %c0_1 = arith.constant 0 : index
    %3 = vector.load %arg7[%c0, %c0_1] : memref<16x32xf32, #tpu.memory_space<vmem>>, vector<16x32xf32>
    %c0_2 = arith.constant 0 : index
    %c0_3 = arith.constant 0 : index
    %4 = vector.load %arg3[%c0_2, %c0_3] : memref<16x32xf32, #tpu.memory_space<vmem>>, vector<16x32xf32>
    %c0_4 = arith.constant 0 : index
    %c0_5 = arith.constant 0 : index
    %5 = vector.load %arg4[%c0_4, %c0_5] : memref<32x32xf32, #tpu.memory_space<vmem>>, vector<32x32xf32>
    %cst = arith.constant dense<0.000000e+00> : vector<16x32xf32>
    %6 = tpu.matmul %4, %5, %cst {dimension_numbers = #tpu.dot_dimension_numbers<[1], [0], [0], [1], [0, 0, 1, 1], [], []>} : vector<16x32xf32>, vector<32x32xf32>, vector<16x32xf32> -> vector<16x32xf32>
    %7 = arith.addf %3, %6 : vector<16x32xf32>
    %c0_6 = arith.constant 0 : index
    %c0_7 = arith.constant 0 : index
    %8 = vector.load %arg7[%c0_6, %c0_7] : memref<16x32xf32, #tpu.memory_space<vmem>>, vector<16x32xf32>
    tpu.vector_store %arg7[%c0_6, %c0_7], %7 {strides = array<i32>} : memref<16x32xf32, #tpu.memory_space<vmem>>, vector<16x32xf32>,
    %c0_i32_8 = arith.constant 0 : i32
    %9 = arith.cmpi eq, %arg2, %c0_i32_8 : i32
    %10 = arith.extui %9 : i1 to i32
    %c0_i32_9 = arith.constant 0 : i32
    %11 = arith.cmpi ne, %10, %c0_i32_9 : i32
    scf.if %11 {
      %c0_10 = arith.constant 0 : index
      %c0_11 = arith.constant 0 : index
      %12 = vector.load %arg7[%c0_10, %c0_11] : memref<16x32xf32, #tpu.memory_space<vmem>>, vector<16x32xf32>
      %c0_12 = arith.constant 0 : index
      %c0_13 = arith.constant 0 : index
      %13 = vector.load %arg5[%c0_12, %c0_13] : memref<1x32xf32, #tpu.memory_space<vmem>>, vector<1x32xf32>
      %14 = vector.broadcast %13 : vector<1x32xf32> to vector<16x32xf32>
      %15 = arith.addf %12, %14 : vector<16x32xf32>
      %c0_14 = arith.constant 0 : index
      %c0_15 = arith.constant 0 : index
      %16 = vector.load %arg6[%c0_14, %c0_15] : memref<16x32xf32, #tpu.memory_space<vmem>>, vector<16x32xf32>
      tpu.vector_store %arg6[%c0_14, %c0_15], %15 {strides = array<i32>} : memref<16x32xf32, #tpu.memory_space<vmem>>, vector<16x32xf32>,
    } else {
    }
    return
  }
  func.func @transform_0(%arg0: i32, %arg1: i32, %arg2: i32) -> (i32, i32) {
    %c0_i32 = arith.constant 0 : i32
    return %arg0, %arg2 : i32, i32
  }
  func.func @transform_1(%arg0: i32, %arg1: i32, %arg2: i32) -> (i32, i32) {
    %c0_i32 = arith.constant 0 : i32
    return %arg2, %arg1 : i32, i32
  }
  func.func @transform_2(%arg0: i32, %arg1: i32, %arg2: i32) -> (i32, i32) {
    %c0_i32 = arith.constant 0 : i32
    %c0_i32_0 = arith.constant 0 : i32
    return %c0_i32, %arg1 : i32, i32
  }
  func.func @transform_3(%arg0: i32, %arg1: i32, %arg2: i32) -> (i32, i32) {
    %c0_i32 = arith.constant 0 : i32
    return %arg0, %arg1 : i32, i32
  }
}

</mosaic_0001>

<bundles_post_ra>
// kernel: tpu_custom_call.1
= control target key start
LH: loop header
LB: loop body
LE: loop exit
PB: predicated region body
PF: predicated region fallthrough
CT: control target
= control target key end

     0   :  { %8 = vsyncpa [#allocation4], 0  ;;  %s325_s0 = inlined_call_operand.hbm [shape: f32[16,32], index: 0, kind: input, shape index: {}]   ;;  %s326_s1 = inlined_call_operand.hbm [shape: f32[32,32], index: 1, kind: input, shape index: {}]   ;;  %s327_s2 = inlined_call_operand.vmem [shape: f32[1,32], index: 2, kind: input, shape index: {}]   ;;  %s328_s3 = inlined_call_operand.hbm [shape: f32[16,32], index: 3, kind: output, shape index: {}]  }
   0x1   :  { %9 = vsyncpa [#allocation7], 0 }
   0x2   :  { %10 = vsyncpa [#allocation5], 0  ;;  %s270_s12 = smov [#allocation3]  }
   0x3   :  { %s16_s13 = sshll.u32 %s270_s12, 4  ;;  %s17_s13 = int_to_ptr.vmem [resolvable:$true] %s16_s13 }
   0x4   :  { %s212_s14 = scalar_lea.vmem %s17_s13, 256  ;;  %p217_p1 = scmp.lt.s32.totalorder %s17_s13, %s17_s13 }
   0x5   :  { %p213_p0 = scmp.ne.s32.totalorder %s17_s13, %s212_s14  ;;  %p218_p2 = scmp.lt.s32.totalorder %s212_s14, %s212_s14 }
   0x7   :  { %p219_p3 = por %p218_p2, %p217_p1 }
   0x9   :  { %p220_p4 = pnand %p219_p3, %p213_p0 }
   0xb   :  { %223 = shalt.err (!%p220_p4)
}
   0xc   :  { %s271_s15 = smov 128   ;;  %s272_s16 = smov 8  }
   0xd   :  { %22 = dma.hbm_to_vmem [thread:$0]  %s325_s0, 256, %s17_s13, [#allocation4], %s271_s15, %s271_s15, %s272_s16  }
   0xe   :  { %s273_s19 = smov [#allocation6]  }
   0xf   :  { %s28_s20 = sshll.u32 %s273_s19, 4  ;;  %s29_s20 = int_to_ptr.vmem [resolvable:$true] %s28_s20 }
  0x10   :  { %s232_s21 = scalar_lea.vmem %s29_s20, 512  ;;  %p237_p6 = scmp.lt.s32.totalorder %s29_s20, %s29_s20 }
  0x11   :  { %p233_p5 = scmp.ne.s32.totalorder %s29_s20, %s232_s21  ;;  %p238_p7 = scmp.lt.s32.totalorder %s232_s21, %s232_s21 }
  0x13   :  { %p239_p8 = por %p238_p7, %p237_p6 }
  0x15   :  { %p240_p9 = pnand %p239_p8, %p233_p5 }
  0x17   :  { %243 = shalt.err (!%p240_p9)
}
  0x18   :  { %34 = dma.hbm_to_vmem [thread:$0]  %s326_s1, 512, %s29_s20, [#allocation7], %s271_s15, %s271_s15, %s272_s16  }
  0x19   :  { %264 = dma.done.wait [#allocation4], 256  }
  0x1a   :  { %265 = vsyncadd [#allocation4], 4294967040 }
  0x1b   :  { %266 = dma.done.wait [#allocation7], 512  }
  0x1c   :  { %267 = vsyncadd [#allocation7], 4294966784  ;;  %vm47_vm0 = vcmask 261120   ;;  %v274_v0 = vmov 0.0   ;;  %v57_v1 = vld [vmem:[#allocation6 + $0x18] sm:$0xff]  ;;  %v56_v2 = vld [vmem:[#allocation6 + $0x10] sm:$0xff] }
  0x1d   :  { %49 = vst.msk [vmem:[#allocation2 + $0x8] sm:$0xff] %vm47_vm0, %v274_v0  ;;  %48 = vst.msk [vmem:[#allocation2] sm:$0xff] %vm47_vm0, %v274_v0  ;;  %187 = vmatprep.subr.mxu0 %v57_v1  ;;  %v52_v3 = vld [vmem:[#allocation3] sm:$0xff]  ;;  %v55_v4 = vld [vmem:[#allocation6 + $0x8] sm:$0xff]  ;;  %s275_s24 = smov [#allocation8]  }
  0x1e   :  { %188 = vmatpush3.msra.mxu0 %v57_v1  ;;  %195 = vmatprep.mubr.msk.f32.mxu0 %vm47_vm0, %v52_v3  ;;  %v54_v5 = vld [vmem:[#allocation6] sm:$0xff]  ;;  %v53_v6 = vld [vmem:[#allocation3 + $0x8] sm:$0xff]  ;;  %s165_s25 = sshll.u32 %s275_s24, 4  ;;  %s166_s25 = int_to_ptr.vmem [resolvable:$true] %s165_s25 }
  0x1f   :  { %189 = vmatprep.subr.mxu0 %v56_v2  ;;  %v180_v13 = vld [vmem:[%s327_s2] ss:$0 sm:$0xff]  ;;  %s244_s26 = scalar_lea.vmem %s166_s25, 256  ;;  %p249_p11 = scmp.lt.s32.totalorder %s166_s25, %s166_s25 }
  0x20   :  { %190 = vmatpush3.msra.mxu0 %v56_v2  ;;  %p245_p10 = scmp.ne.s32.totalorder %s166_s25, %s244_s26  ;;  %p250_p12 = scmp.lt.s32.totalorder %s244_s26, %s244_s26 }
  0x21   :  { %191 = vmatprep.subr.mxu0 %v55_v4 }
  0x22   :  { %192 = vmatpush3.msra.mxu0 %v55_v4  ;;  %p251_p13 = por %p250_p12, %p249_p11 }
  0x23   :  { %193 = vmatprep.subr.mxu0 %v54_v5 }
  0x24   :  { %194 = vmatpush3.msra.mxu0 %v54_v5  ;;  %v51_v7 = vld [vmem:[#allocation2 + $0x8] sm:$0xff]  ;;  %v50_v9 = vld [vmem:[#allocation2] sm:$0xff]  ;;  %p252_p0 = pnand %p251_p13, %p245_p10 }
  0x25   :  { %196 = vmatmul.mubr.msk.f32.vlgmr.msra.gmra.mxu0 %vm47_vm0, %v53_v6 }
  0xe5   :  { %v197_v8 = vpop.f32.mrf.mxu0 }
  0xe6   :  { %v141_v10 = vadd.f32 %v197_v8, %v51_v7 }
  0xe7   :  { %v131_v11 = vpop.f32.mrf.mxu0 }
  0xe8   :  { %143 = vst.msk [vmem:[#allocation2 + $0x8] sm:$0xff] %vm47_vm0, %v141_v10  ;;  %v140_v12 = vadd.f32 %v131_v11, %v50_v9 }
  0xea   :  { %142 = vst.msk [vmem:[#allocation2] sm:$0xff] %vm47_vm0, %v140_v12 }
  0xef   :  { %v148_v14 = vld [vmem:[#allocation2 + $0x8] sm:$0xff] }
  0xf0   :  { %v157_v15 = vadd.f32 %v180_v13, %v148_v14 }
  0xf1   :  { %v147_v16 = vld [vmem:[#allocation2] sm:$0xff] }
  0xf2   :  { %v156_v17 = vadd.f32 %v180_v13, %v147_v16  ;;  %159 = vst.msk [vmem:[#allocation8 + $0x8] sm:$0xff] %vm47_vm0, %v157_v15 }
  0xf4   :  { %158 = vst.msk [vmem:[#allocation8] sm:$0xff] %vm47_vm0, %v156_v17 }
  0xf5   :  { %255 = shalt.err (!%p252_p0)
}
  0xf6   :  { %171 = dma.vmem_to_hbm [thread:$0]  %s166_s25, 256, %s328_s3, [#allocation5], %s271_s15, %s271_s15, %s272_s16  }
  0xf7   :  { %268 = dma.done.wait [#allocation5], 256  }
  0xf8   :  { %269 = vsyncadd [#allocation5], 4294967040 }
  0xf9   :  { %175 = vsyncpa [#allocation4], 1 }
  0xfa   :  { %176 = vsyncpa [#allocation7], 1 }
  0xfb   :  { %177 = vsyncpa [#allocation5], 1 }

</bundles_post_ra>
